<compile_context>
chip_gen: v7x
topology: tpu7x:2x2x1
jax: 0.10.0
libtpu: 0.0.40
codegen_flags: <defaults>
</compile_context>

<pallas_src>
import jax
import jax.numpy as jnp
from jax.experimental import pallas as pl
from jax.experimental.pallas import tpu as pltpu

HIDDEN = 20
TILE_B = 512  # batch lanes per grid step (multiple of 128)


def pinn_mlp_kernel(x_ref, w1_ref, b1_ref, w2_ref, b2_ref, w3_ref, b3_ref, o_ref):
    # x_ref:  (1, TILE_B)        batch on lanes
    # w1_ref: (HIDDEN, 1)        PyTorch (out, in) storage
    # b1_ref: (HIDDEN, 1)
    # w2_ref: (HIDDEN, HIDDEN)   PyTorch (out, in) storage
    # b2_ref: (HIDDEN, 1)
    # w3_ref: (HIDDEN, 1)        W3 transposed to a column (in, out=1)
    # b3_ref: (1, 1)
    # o_ref:  (1, TILE_B)
    x = x_ref[...]                                    # (1, B)

    # Layer 1: rank-1 outer product on the VPU (no MXU for K=1).
    h1 = jnp.tanh(w1_ref[...] * x + b1_ref[...])      # (20, B)

    # Layer 2: the only real matmul -> MXU, batch on the lane/N dimension.
    h2 = jnp.tanh(
        jnp.dot(w2_ref[...], h1, preferred_element_type=jnp.float32)
        + b2_ref[...]
    )                                                 # (20, B)

    # Layer 3: length-20 weighted sum -> VPU mul + sublane reduce (no MXU).
    o_ref[...] = (
        jnp.sum(w3_ref[...] * h2, axis=0, keepdims=True) + b3_ref[...]
    )                                                 # (1, B)


def pinn_forward(x, params):
    """x: (N, 1) float32.  params: PyTorch-style (W(out,in), b(out,)) x 3."""
    w1, b1, w2, b2, w3, b3 = params
    n = x.shape[0]

    # Lane-dense layout: batch on lanes; pad batch to a multiple of TILE_B.
    x_t = x.reshape(1, n)
    pad = (-n) % TILE_B
    if pad:
        x_t = jnp.pad(x_t, ((0, 0), (0, pad)))
    n_pad = n + pad
    grid = (n_pad // TILE_B,)

    # Reshape params to the column layouts the kernel expects.
    w1_c = w1.reshape(HIDDEN, 1)          # (20, 1)
    b1_c = b1.reshape(HIDDEN, 1)          # (20, 1)
    w2_m = w2                             # (20, 20)  (out, in)
    b2_c = b2.reshape(HIDDEN, 1)          # (20, 1)
    w3_c = w3.reshape(1, HIDDEN).T        # (20, 1)   column of W3
    b3_c = b3.reshape(1, 1)               # (1, 1)

    bcast = lambda i: (0, 0)  # constant-index full blocks -> stay VMEM-resident

    out_t = pl.pallas_call(
        pinn_mlp_kernel,
        out_shape=jax.ShapeDtypeStruct((1, n_pad), jnp.float32),
        grid_spec=pltpu.PrefetchScalarGridSpec(
            num_scalar_prefetch=0,
            grid=grid,
            in_specs=[
                pl.BlockSpec((1, TILE_B), lambda i: (0, i)),   # x (lane-dense)
                pl.BlockSpec((HIDDEN, 1), bcast),              # w1 column
                pl.BlockSpec((HIDDEN, 1), bcast),              # b1 column
                pl.BlockSpec((HIDDEN, HIDDEN), bcast),         # w2 (out, in)
                pl.BlockSpec((HIDDEN, 1), bcast),              # b2 column
                pl.BlockSpec((HIDDEN, 1), bcast),              # w3 column
                pl.BlockSpec((1, 1), bcast),                   # b3
            ],
            out_specs=pl.BlockSpec((1, TILE_B), lambda i: (0, i)),
        ),
        compiler_params=pltpu.CompilerParams(
            dimension_semantics=("parallel",),
        ),
    )(x_t, w1_c, b1_c, w2_m, b2_c, w3_c, b3_c)

    return out_t[:, :n].reshape(n, 1)


def init_params(key):
    """PyTorch nn.Linear default init: U(-1/sqrt(fan_in), +1/sqrt(fan_in))."""
    ks = jax.random.split(key, 6)

    def unif(k, shape, fan_in):
        bound = 1.0 / jnp.sqrt(fan_in)
        return jax.random.uniform(k, shape, jnp.float32, -bound, bound)

    w1 = unif(ks[0], (HIDDEN, 1), 1.0)               # (out, in)
    b1 = unif(ks[1], (HIDDEN,), 1.0)
    w2 = unif(ks[2], (HIDDEN, HIDDEN), float(HIDDEN))
    b2 = unif(ks[3], (HIDDEN,), float(HIDDEN))
    w3 = unif(ks[4], (1, HIDDEN), float(HIDDEN))
    b3 = unif(ks[5], (1,), float(HIDDEN))
    return (w1, b1, w2, b2, w3, b3)


def reference_forward(x, params):
    """Pure-JAX reference matching PyTorch semantics exactly."""
    w1, b1, w2, b2, w3, b3 = params
    h1 = jnp.tanh(x @ w1.T + b1)
    h2 = jnp.tanh(h1 @ w2.T + b2)
    return h2 @ w3.T + b3


if __name__ == "__main__":
    key = jax.random.PRNGKey(0)
    pkey, xkey = jax.random.split(key)
    params = init_params(pkey)

    # A modest batch of collocation points, (N, 1) like the PINN input.
    # N is deliberately NOT a multiple of TILE_B to exercise the padding path;
    # padded N (1024) gives grid=(2,) so both v7x TensorCores get work.
    N = 1000
    x = jax.random.uniform(xkey, (N, 1), jnp.float32, -1.0, 1.0)

    out = pinn_forward(x, params)
    out = jax.block_until_ready(out)

    ref = reference_forward(x, params)
    assert out.shape == (N, 1)
    assert jnp.allclose(out, ref, atol=1e-5, rtol=1e-5)

    print("KERNEL_OK")
</pallas_src>

<mosaic_0001>
module attributes {stable_mosaic.version = 11 : i64} {
  func.func @pinn_mlp_kernel(%arg0: i32, %arg1: memref<1x512xf32, #tpu.memory_space<vmem>>, %arg2: memref<20x1xf32, #tpu.memory_space<vmem>>, %arg3: memref<20x1xf32, #tpu.memory_space<vmem>>, %arg4: memref<20x20xf32, #tpu.memory_space<vmem>>, %arg5: memref<20x1xf32, #tpu.memory_space<vmem>>, %arg6: memref<20x1xf32, #tpu.memory_space<vmem>>, %arg7: memref<1x1xf32, #tpu.memory_space<vmem>>, %arg8: memref<1x512xf32, #tpu.memory_space<vmem>>) attributes {dimension_semantics = [#tpu.dimension_semantics<parallel>], iteration_bounds = array<i64: 2>, scalar_prefetch = 0 : i64, scratch_operands = 0 : i64, tpu.core_type = #tpu.core_type<tc>, window_params = [{transform_indices = @transform_0, window_bounds = array<i64: 1, 512>}, {pipeline_mode = #tpu.pipeline_mode<synchronous>, transform_indices = @transform_1, window_bounds = array<i64: 20, 1>}, {pipeline_mode = #tpu.pipeline_mode<synchronous>, transform_indices = @transform_2, window_bounds = array<i64: 20, 1>}, {pipeline_mode = #tpu.pipeline_mode<synchronous>, transform_indices = @transform_3, window_bounds = array<i64: 20, 20>}, {pipeline_mode = #tpu.pipeline_mode<synchronous>, transform_indices = @transform_4, window_bounds = array<i64: 20, 1>}, {pipeline_mode = #tpu.pipeline_mode<synchronous>, transform_indices = @transform_5, window_bounds = array<i64: 20, 1>}, {pipeline_mode = #tpu.pipeline_mode<synchronous>, transform_indices = @transform_6, window_bounds = array<i64: 1, 1>}, {transform_indices = @transform_7, window_bounds = array<i64: 1, 512>}]} {
    %c0 = arith.constant 0 : index
    %c0_0 = arith.constant 0 : index
    %0 = vector.load %arg1[%c0, %c0_0] : memref<1x512xf32, #tpu.memory_space<vmem>>, vector<1x512xf32>
    %c0_1 = arith.constant 0 : index
    %c0_2 = arith.constant 0 : index
    %1 = vector.load %arg2[%c0_1, %c0_2] : memref<20x1xf32, #tpu.memory_space<vmem>>, vector<20x1xf32>
    %2 = vector.broadcast %1 : vector<20x1xf32> to vector<20x512xf32>
    %3 = vector.broadcast %0 : vector<1x512xf32> to vector<20x512xf32>
    %4 = arith.mulf %2, %3 : vector<20x512xf32>
    %c0_3 = arith.constant 0 : index
    %c0_4 = arith.constant 0 : index
    %5 = vector.load %arg3[%c0_3, %c0_4] : memref<20x1xf32, #tpu.memory_space<vmem>>, vector<20x1xf32>
    %6 = vector.broadcast %5 : vector<20x1xf32> to vector<20x512xf32>
    %7 = arith.addf %4, %6 : vector<20x512xf32>
    %8 = math.tanh %7 : vector<20x512xf32>
    %c0_5 = arith.constant 0 : index
    %c0_6 = arith.constant 0 : index
    %9 = vector.load %arg4[%c0_5, %c0_6] : memref<20x20xf32, #tpu.memory_space<vmem>>, vector<20x20xf32>
    %cst = arith.constant dense<0.000000e+00> : vector<20x512xf32>
    %10 = tpu.matmul %9, %8, %cst {dimension_numbers = #tpu.dot_dimension_numbers<[1], [0], [0], [1], [0, 0, 1, 1], [], []>} : vector<20x20xf32>, vector<20x512xf32>, vector<20x512xf32> -> vector<20x512xf32>
    %c0_7 = arith.constant 0 : index
    %c0_8 = arith.constant 0 : index
    %11 = vector.load %arg5[%c0_7, %c0_8] : memref<20x1xf32, #tpu.memory_space<vmem>>, vector<20x1xf32>
    %12 = vector.broadcast %11 : vector<20x1xf32> to vector<20x512xf32>
    %13 = arith.addf %10, %12 : vector<20x512xf32>
    %14 = math.tanh %13 : vector<20x512xf32>
    %c0_9 = arith.constant 0 : index
    %c0_10 = arith.constant 0 : index
    %15 = vector.load %arg6[%c0_9, %c0_10] : memref<20x1xf32, #tpu.memory_space<vmem>>, vector<20x1xf32>
    %16 = vector.broadcast %15 : vector<20x1xf32> to vector<20x512xf32>
    %17 = arith.mulf %16, %14 : vector<20x512xf32>
    %cst_11 = arith.constant dense<0.000000e+00> : vector<512xf32>
    %18 = vector.multi_reduction <add>, %17, %cst_11 [0] : vector<20x512xf32> to vector<512xf32>
    %19 = vector.shape_cast %18 : vector<512xf32> to vector<1x512xf32>
    %c0_12 = arith.constant 0 : index
    %c0_13 = arith.constant 0 : index
    %20 = vector.load %arg7[%c0_12, %c0_13] : memref<1x1xf32, #tpu.memory_space<vmem>>, vector<1x1xf32>
    %21 = vector.broadcast %20 : vector<1x1xf32> to vector<1x512xf32>
    %22 = arith.addf %19, %21 : vector<1x512xf32>
    %c0_14 = arith.constant 0 : index
    %c0_15 = arith.constant 0 : index
    %23 = vector.load %arg8[%c0_14, %c0_15] : memref<1x512xf32, #tpu.memory_space<vmem>>, vector<1x512xf32>
    tpu.vector_store %arg8[%c0_14, %c0_15], %22 {strides = array<i32>} : memref<1x512xf32, #tpu.memory_space<vmem>>, vector<1x512xf32>,
    return
  }
  func.func @transform_0(%arg0: i32) -> (i32, i32) {
    %c0_i32 = arith.constant 0 : i32
    %c0_i32_0 = arith.constant 0 : i32
    return %c0_i32, %arg0 : i32, i32
  }
  func.func @transform_1(%arg0: i32) -> (i32, i32) {
    %c0_i32 = arith.constant 0 : i32
    %c0_i32_0 = arith.constant 0 : i32
    %c0_i32_1 = arith.constant 0 : i32
    return %c0_i32, %c0_i32_0 : i32, i32
  }
  func.func @transform_2(%arg0: i32) -> (i32, i32) {
    %c0_i32 = arith.constant 0 : i32
    %c0_i32_0 = arith.constant 0 : i32
    %c0_i32_1 = arith.constant 0 : i32
    return %c0_i32, %c0_i32_0 : i32, i32
  }
  func.func @transform_3(%arg0: i32) -> (i32, i32) {
    %c0_i32 = arith.constant 0 : i32
    %c0_i32_0 = arith.constant 0 : i32
    %c0_i32_1 = arith.constant 0 : i32
    return %c0_i32, %c0_i32_0 : i32, i32
  }
  func.func @transform_4(%arg0: i32) -> (i32, i32) {
    %c0_i32 = arith.constant 0 : i32
    %c0_i32_0 = arith.constant 0 : i32
    %c0_i32_1 = arith.constant 0 : i32
    return %c0_i32, %c0_i32_0 : i32, i32
  }
  func.func @transform_5(%arg0: i32) -> (i32, i32) {
    %c0_i32 = arith.constant 0 : i32
    %c0_i32_0 = arith.constant 0 : i32
    %c0_i32_1 = arith.constant 0 : i32
    return %c0_i32, %c0_i32_0 : i32, i32
  }
  func.func @transform_6(%arg0: i32) -> (i32, i32) {
    %c0_i32 = arith.constant 0 : i32
    %c0_i32_0 = arith.constant 0 : i32
    %c0_i32_1 = arith.constant 0 : i32
    return %c0_i32, %c0_i32_0 : i32, i32
  }
  func.func @transform_7(%arg0: i32) -> (i32, i32) {
    %c0_i32 = arith.constant 0 : i32
    %c0_i32_0 = arith.constant 0 : i32
    return %c0_i32, %arg0 : i32, i32
  }
}

</mosaic_0001>

<bundles_post_ra>
// kernel: tpu_custom_call.1
= control target key start
LH: loop header
LB: loop body
LE: loop exit
PB: predicated region body
PF: predicated region fallthrough
CT: control target
= control target key end

     0   :  { %s1190_s0 = inlined_call_operand.vmem [shape: f32[1,1024], index: 0, kind: input, shape index: {}]   ;;  %s1191_s1 = inlined_call_operand.vmem [shape: f32[20,1], index: 1, kind: input, shape index: {}]   ;;  %s1192_s2 = inlined_call_operand.vmem [shape: f32[20,1], index: 2, kind: input, shape index: {}]   ;;  %s1193_s3 = inlined_call_operand.vmem [shape: f32[20,20], index: 3, kind: input, shape index: {}]   ;;  %s1194_s4 = inlined_call_operand.vmem [shape: f32[20,1], index: 4, kind: input, shape index: {}]   ;;  %s1195_s5 = inlined_call_operand.vmem [shape: f32[20,1], index: 5, kind: input, shape index: {}]   ;;  %s1196_s6 = inlined_call_operand.<no memory space> [shape: f32[1,1], index: 6, kind: input, shape index: {}]   ;;  %s1197_s7 = inlined_call_operand.hbm [shape: f32[1,1024], index: 7, kind: output, shape index: {}]  }
   0x1   :  { %v12_v0 = vstv %s1196_s6 }
   0x2   :  { %13 = vst [vmem:[#allocation2] sm:$0x1] %v12_v0 }
   0x3   :  { %14 = vsyncpa [#allocation4], 0 }
   0x4   :  { %16 = vsyncpa [#allocation4 + $0x1], 0  ;;  %s1013_s26 = smov 0   ;;  %s1015_s27 = smov 0  }
   0x5   :  { %s1017_s28 = smov 0   ;;  %s1019_s29 = smov 0  }
   0x6 LB: > { %s1034_s6 = sadd.s32 4294967295, %s964_s29   ;;  %s780_s30 = sadd.s32 4294967294, %s964_s29   ;;  %s964_s29 = sphi %s1019_s29, %s1203_s29   ;;  %s960_s28 = sphi %s1017_s28, %s1202_s28   ;;  %s956_s27 = sphi %s1015_s27, %s1201_s27   ;;  %s952_s26 = sphi %s1013_s26, %s1200_s26  }
   0x7   : > { %s1038_s8 = sadd.s32 1, %s964_s29   ;;  %s181_s9 = sadd.s32 1, %s960_s28 }
   0x8   : > { %s178_s10 = ssub.s32 %s964_s29, %s1038_s8  ;;  %p191_p0 = scmp.ne.s32.totalorder %s960_s28, %s956_s27 }
   0x9   : > { %p179_p1 = scmp.eq.s32.totalorder %s178_s10, 0  ;;  %p192_p2 = scmp.eq.s32.totalorder %s1034_s6, 1 }
   0xa   : > { %p197_p3 = scmp.ne.s32.totalorder %s956_s27, %s952_s26  ;;  %p198_p4 = scmp.eq.s32.totalorder %s780_s30, 1 }
   0xb   : > { %s1049_s11 = scalar_select %p179_p1, %s960_s28, %s181_s9  }
   0xc   : > { %p1051_p5 = por %p192_p2, %p191_p0  ;;  %p1055_p6 = por %p198_p4, %p197_p3 }
   0xd   : > { %p783_p7 = scmp.ge.s32.totalorder %s964_s29, 1  ;;  %p242_p8 = scmp.lt.s32.totalorder %s964_s29, 3 }
   0xf   : > { %p243_p9 = pnand %p783_p7, %p242_p8 }
  0x10   : > { %v331_v1 = vld [vmem:[%s1192_s2] sm:$0xff] (!%p243_p9)  ;;  %v966_v3 = vmov (!%p243_p9), 0   ;;  %v332_v4 = vld [vmem:[%s1192_s2 + $0x8] sm:$0xff] (!%p243_p9)  ;;  %v333_v6 = vld [vmem:[%s1192_s2 + $0x10] sm:$0xf] (!%p243_p9)  ;;  %v967_v15 = vmov (!%p243_p9), 0.0   ;;  %v299_v16 = vlaneseq (!%p243_p9) }
  0x11   : > { %246 = sbr.rel (%p243_p9) target bundleno = 451 (0x1c3), region = 48  ;;  %v280_v2 = vld [vmem:[%s1191_s1] sm:$0xff] (!%p243_p9)  ;;  %853 = vset.pattern.permute.xlu1 (!%p243_p9), %v966_v3  ;;  %852 = vset.pattern.permute.xlu0 (!%p243_p9), %v966_v3  ;;  %v281_v5 = vld [vmem:[%s1191_s1 + $0x8] sm:$0xff] (!%p243_p9)  ;;  %v282_v7 = vld [vmem:[%s1191_s1 + $0x10] sm:$0xf] (!%p243_p9)  ;;  %s785_s23 = sshll.u32 (!%p243_p9), %s1034_s6, 2 }
  0x12   : > { %336 = vperm.xlu1 (!%p243_p9), %853, %v331_v1   ;;  %285 = vperm.xlu0 (!%p243_p9), %852, %v280_v2   ;;  %v377_v8 = vld [vmem:[%s1194_s4 + $0x8] sm:$0xff] (!%p243_p9)  ;;  %v376_v9 = vld [vmem:[%s1194_s4] sm:$0xff] (!%p243_p9)  ;;  %v378_v11 = vld [vmem:[%s1194_s4 + $0x10] sm:$0xf] (!%p243_p9)  ;;  %p274_p10 = scmp.lt.s32.totalorder (!%p243_p9), %s785_s23, 7  ;;  %v1101_v17 = vshrl.u32 (!%p243_p9), %v299_v16, 7 }
  0x13   : > { %v595_v10 = vld [vmem:[%s1195_s5] sm:$0xff] (!%p243_p9)  ;;  %v597_v12 = vld [vmem:[%s1195_s5 + $0x10] sm:$0xf] (!%p243_p9)  ;;  %v596_v13 = vld [vmem:[%s1195_s5 + $0x8] sm:$0xff] (!%p243_p9)  ;;  %481 = vmatprep.mubr.f32.mxu0 (!%p243_p9), %v967_v15  ;;  %564 = vmatprep.mubr.f32.mxu1 (!%p243_p9), %v967_v15  ;;  %vm404_vm0 = vcmask (!%p243_p9), 1043456   ;;  %vm394_vm1 = vcmask (!%p243_p9), 162816  }
  0x14   : > { %v661_v14 = vld [vmem:[#allocation2] sm:$0x1] (!%p243_p9)  ;;  %v301_v18 = vsub.s32 (!%p243_p9), 0, %v1101_v17  ;;  %v305_v19 = vsub.s32 (!%p243_p9), 1, %v1101_v17  ;;  %v309_v20 = vsub.s32 (!%p243_p9), 2, %v1101_v17  ;;  %v313_v21 = vsub.s32 (!%p243_p9), 3, %v1101_v17 }
  0x15   : > { %s270_s18 = sand.u32 (!%p243_p9), 1, %s956_s27   ;;  %s801_s20 = sshll.u32 (!%p243_p9), %s1034_s6, 6  ;;  %vm706_vm2 = vcmp.lt.s32.totalorder (!%p243_p9), %v299_v16, 512 }
  0x16   : > { %341 = vperm.xlu1 (!%p243_p9), %853, %v332_v4   ;;  %290 = vperm.xlu0 (!%p243_p9), %852, %v281_v5   ;;  %s784_s19 = sshll.u32 (!%p243_p9), %s270_s18, 2  ;;  %s1148_s25 = scalar_lea.hbm (!%p243_p9), %s1197_s7, %s801_s20 }
  0x17   : > { %s272_s21 = scalar_lea.vmem (!%p243_p9), [#allocation3], %s784_s19  ;;  %s969_s6 = smov (!%p243_p9), [#allocation3]  }
  0x18   : > { %s1205_s23 = smov (!%p274_p10, %s785_s23), 7  ;;  %s724_s22 = sshll.u32 %s272_s21, 4  ;;  %s1150_s22 = int_to_ptr.vmem [resolvable:$true] %s724_s22 }
  0x19   : > { %s276_s30 = scalar_lea.vmem %s1190_s0, %s1205_s23  ;;  %s902_s9 = scalar_lea.vmem %s1150_s22, 64 }
  0x1a   : > { %346 = vperm.xlu1 %853, %v333_v6   ;;  %295 = vperm.xlu0 %852, %v282_v7   ;;  %v279_v22 = vld [vmem:[%s276_s30] sm:$0xf]  ;;  %s710_s30 = scalar_lea.sflag [#allocation4], %s270_s18  ;;  %p903_p11 = scmp.ne.s32.totalorder %s1150_s22, %s902_s9 }
  0x1b   : > { %v302_v23 = vrot.slane %v279_v22, %v301_v18  ;;  %v306_v24 = vrot.slane %v279_v22, %v305_v19  ;;  %v310_v25 = vrot.slane %v279_v22, %v309_v20  ;;  %v314_v26 = vrot.slane %v279_v22, %v313_v21  ;;  %v373_v7 = vld [vmem:[%s1193_s3] sm:$0xff]  ;;  %s906_s10 = sshll.u32 %s969_s6, 4  ;;  %s907_s10 = int_to_ptr.vmem [resolvable:$false] %s906_s10 }
  0x1c   : > { %p904_p12 = pnand %p903_p11, %p1051_p5  ;;  %s908_s14 = scalar_lea.vmem %s907_s10, 128 }
  0x1d   : > { %p909_p0 = scmp.lt.s32.totalorder %s1150_s22, %s907_s10  ;;  %p910_p1 = scmp.lt.s32.totalorder %s908_s14, %s902_s9 }
  0x1e   : > { %386 = vperm.xlu1 %853, %v377_v8   ;;  %381 = vperm.xlu0 %852, %v376_v9   ;;  %p905_p13 = pneg %p904_p12 }
  0x1f   : > { %p911_p2 = por %p910_p1, %p909_p0 }
  0x21   : > { %p912_p3 = pnand %p911_p2, %p905_p13 }
  0x22   : > { %600 = vperm.xlu1 %853, %v595_v10   ;;  %391 = vperm.xlu0 %852, %v378_v11   ;;  %v374_v10 = vld [vmem:[%s1193_s3 + $0x8] sm:$0xff]  ;;  %v375_v11 = vld [vmem:[%s1193_s3 + $0x10] sm:$0xf] }
  0x26   : > { %610 = vperm.xlu1 %853, %v597_v12   ;;  %605 = vperm.xlu0 %852, %v596_v13  }
  0x2a   : > { %664 = vperm.xlu0 %852, %v661_v14  }
  0x91   : > { %v337_v27 = vpop.permute.xlu1 %336  ;;  %v286_v28 = vpop.permute.xlu0 %285 }
  0x92   : > { %v319_v29 = vmul.f32 %v302_v23, %v286_v28  ;;  %v320_v30 = vmul.f32 %v306_v24, %v286_v28  ;;  %v321_v31 = vmul.f32 %v310_v25, %v286_v28  ;;  %v322_v32 = vmul.f32 %v314_v26, %v286_v28 }
  0x94   : > { %v349_v33 = vadd.f32 %v337_v27, %v319_v29  ;;  %v350_v34 = vadd.f32 %v337_v27, %v320_v30  ;;  %v351_v35 = vadd.f32 %v337_v27, %v321_v31  ;;  %v352_v36 = vadd.f32 %v337_v27, %v322_v32 }
  0x95   : > { %v342_v37 = vpop.permute.xlu1 %341  ;;  %v291_v38 = vpop.permute.xlu0 %290 }
  0x96   : > { %854 = vtanh.f32 %v349_v33  ;;  %v323_v39 = vmul.f32 %v302_v23, %v291_v38  ;;  %v324_v40 = vmul.f32 %v306_v24, %v291_v38  ;;  %v325_v41 = vmul.f32 %v310_v25, %v291_v38 }
  0x97   : > { %856 = vtanh.f32 %v350_v34  ;;  %v326_v42 = vmul.f32 %v314_v26, %v291_v38 }
  0x98   : > { %858 = vtanh.f32 %v351_v35  ;;  %v353_v43 = vadd.f32 %v342_v37, %v323_v39  ;;  %v354_v44 = vadd.f32 %v342_v37, %v324_v40  ;;  %v355_v45 = vadd.f32 %v342_v37, %v325_v41 }
  0x99   : > { %860 = vtanh.f32 %v352_v36  ;;  %v356_v46 = vadd.f32 %v342_v37, %v326_v42  ;;  %v296_v47 = vpop.permute.xlu0 %295  ;;  %v347_v50 = vpop.permute.xlu1 %346 }
  0x9a   : > { %862 = vtanh.f32 %v353_v43  ;;  %v327_v48 = vmul.f32 %v302_v23, %v296_v47  ;;  %v328_v49 = vmul.f32 %v306_v24, %v296_v47  ;;  %v330_v51 = vmul.f32 %v314_v26, %v296_v47 }
  0x9b   : > { %864 = vtanh.f32 %v354_v44  ;;  %v329_v52 = vmul.f32 %v310_v25, %v296_v47 }
  0x9c   : > { %866 = vtanh.f32 %v355_v45  ;;  %v358_v53 = vadd.f32 %v347_v50, %v328_v49  ;;  %v360_v54 = vadd.f32 %v347_v50, %v330_v51  ;;  %v357_v55 = vadd.f32 %v347_v50, %v327_v48 }
  0x9d   : > { %868 = vtanh.f32 %v356_v46  ;;  %v359_v57 = vadd.f32 %v347_v50, %v329_v52  ;;  %v382_v12 = vpop.permute.xlu0 %381  ;;  %v387_v24 = vpop.permute.xlu1 %386 }
  0x9e   : > { %870 = vtanh.f32 %v358_v53 }
  0x9f   : > { %872 = vtanh.f32 %v360_v54 }
  0xa0   : > { %v855_v56 = vpop.eup %854  ;;  %874 = vtanh.f32 %v357_v55 }
  0xa1   : > { %v857_v58 = vpop.eup %856  ;;  %876 = vtanh.f32 %v359_v57  ;;  %v392_v32 = vpop.permute.xlu0 %391 }
  0xa2   : > { %v859_v59 = vpop.eup %858  ;;  %v601_v45 = vpop.permute.xlu1 %600 }
  0xa3   : > { %v861_v60 = vpop.eup %860 }
  0xa4   : > { %v863_v61 = vpop.eup %862 }
  0xa5   : > { %v865_v62 = vpop.eup %864  ;;  %v804_v63 = vpack.c.bf16 %v863_v61, %v855_v56  ;;  %v606_v48 = vpop.permute.xlu0 %605 }
  0xa6   : > { %v867_v0 = vpop.eup %866  ;;  %v802_v1 = vpack.c.bf16 %v865_v62, %v857_v58 }
  0xa7   : > { %v869_v2 = vpop.eup %868  ;;  %v808_v3 = vpack.c.bf16 %v867_v0, %v859_v59 }
  0xa8   : > { %803 = vmatprep.subr.bf16.mxu0 %v802_v1  ;;  %v806_v4 = vpack.c.bf16 %v869_v2, %v861_v60  ;;  %v871_v5 = vpop.eup %870  ;;  %v611_v60 = vpop.permute.xlu1 %610 }
  0xa9   : > { %805 = vmatpush1.bf16.msra.mxu0 %v804_v63  ;;  %v873_v6 = vpop.eup %872 }
  0xaa   : > { %807 = vmatprep.subr.bf16.mxu1 %v806_v4  ;;  %786 = vmatprep.subr.msk.mxu0 %vm404_vm0, %v871_v5  ;;  %v875_v8 = vpop.eup %874 }
  0xab   : > { %809 = vmatpush1.bf16.msra.mxu1 %v808_v3  ;;  %v877_v9 = vpop.eup %876 }
  0xac   : > { %791 = vmatprep.subr.msk.mxu1 %vm404_vm0, %v873_v6 }
  0xad   : > { %787 = vmatpush1.msk.msra.mxu0 %vm404_vm0, %v875_v8 }
  0xae   : > { %788 = vmatmul.mubr.msk.f32.vlgmr.msra.gmra.mrb[0].mxu0 %vm394_vm1, %v373_v7 }
  0xaf   : > { %792 = vmatpush1.msk.msra.mxu1 %vm404_vm0, %v877_v9  ;;  %487 = vmatprep.mubr.f32.mxu0 %v967_v15 }
  0xb0   : > { %793 = vmatmul.mubr.msk.f32.vlgmr.msra.gmra.mrb[0].mxu1 %vm394_vm1, %v373_v7 }
  0xb1   : > { %570 = vmatprep.mubr.f32.mxu1 %v967_v15 }
  0xb2   : > { %789 = vmatmul.mubr.msk.f32.gmra.mrb[2].mxu0 %vm394_vm1, %v374_v10 }
  0xb3   : > { %493 = vmatprep.mubr.f32.mxu0 %v967_v15 }
  0xb4   : > { %794 = vmatmul.mubr.msk.f32.gmra.mrb[2].mxu1 %vm394_vm1, %v374_v10 }
  0xb5   : > { %576 = vmatprep.mubr.f32.mxu1 %v967_v15 }
  0xb6   : > { %790 = vmatmul.mubr.msk.f32.gmra.mrb[4].mxu0 %vm394_vm1, %v375_v11 }
  0xb8   : > { %795 = vmatmul.mubr.msk.f32.gmra.mrb[4].mxu1 %vm394_vm1, %v375_v11 }
 0x181   : > { %v483_v13 = vpop.f32.mrb[0].mxu0 }
 0x182   : > { %v484_v14 = vadd.f32 %v483_v13, %v382_v12  ;;  %v485_v19 = vpop.f32.mrb[1].mxu0 }
 0x183   : > { %v566_v20 = vpop.f32.mrb[0].mxu1  ;;  %v486_v21 = vadd.f32 %v485_v19, %v382_v12 }
 0x184   : > { %878 = vtanh.f32 %v484_v14  ;;  %v567_v22 = vadd.f32 %v566_v20, %v382_v12  ;;  %v568_v23 = vpop.f32.mrb[1].mxu1 }
 0x185   : > { %880 = vtanh.f32 %v486_v21  ;;  %v569_v25 = vadd.f32 %v568_v23, %v382_v12  ;;  %v489_v26 = vpop.f32.mrb[2].mxu0 }
 0x186   : > { %882 = vtanh.f32 %v567_v22  ;;  %v490_v27 = vadd.f32 %v489_v26, %v387_v24  ;;  %v491_v15 = vpop.f32.mrb[3].mxu0 }
 0x187   : > { %884 = vtanh.f32 %v569_v25  ;;  %v572_v28 = vpop.f32.mrb[2].mxu1  ;;  %v492_v29 = vadd.f32 %v491_v15, %v387_v24 }
 0x188   : > { %886 = vtanh.f32 %v490_v27  ;;  %v573_v30 = vadd.f32 %v572_v28, %v387_v24  ;;  %v574_v31 = vpop.f32.mrb[3].mxu1 }
 0x189   : > { %888 = vtanh.f32 %v492_v29  ;;  %v575_v33 = vadd.f32 %v574_v31, %v387_v24  ;;  %v495_v34 = vpop.f32.mrb[4].mxu0 }
 0x18a   : > { %890 = vtanh.f32 %v573_v30  ;;  %v496_v35 = vadd.f32 %v495_v34, %v392_v32  ;;  %v497_v36 = vpop.f32.mrb[5].mxu0  ;;  %v968_v30 = vmov 1966171168   ;;  %v665_v34 = vpop.permute.xlu0 %664 }
 0x18b   : > { %892 = vtanh.f32 %v575_v33  ;;  %v578_v37 = vpop.f32.mrb[4].mxu1  ;;  %v498_v38 = vadd.f32 %v497_v36, %v392_v32  ;;  %v682_v31 = vunpack.c.l.s4 %v968_v30 }
 0x18c   : > { %894 = vtanh.f32 %v496_v35  ;;  %v579_v39 = vadd.f32 %v578_v37, %v392_v32  ;;  %v580_v40 = vpop.f32.mrb[5].mxu1 }
 0x18d   : > { %896 = vtanh.f32 %v498_v38  ;;  %v581_v41 = vadd.f32 %v580_v40, %v392_v32 }
 0x18e   : > { %v879_v42 = vpop.eup %878  ;;  %898 = vtanh.f32 %v579_v39 }
 0x18f   : > { %v881_v43 = vpop.eup %880  ;;  %900 = vtanh.f32 %v581_v41  ;;  %v613_v50 = vmul.f32 %v879_v42, %v601_v45  ;;  %v683_v41 = vunpack.c.0.s8 %v682_v31  ;;  %v670_v42 = vrot.slane %v665_v34, %v301_v18 }
 0x190   : > { %v883_v44 = vpop.eup %882  ;;  %v614_v53 = vmul.f32 %v881_v43, %v601_v45 }
 0x191   : > { %v885_v46 = vpop.eup %884  ;;  %v615_v56 = vmul.f32 %v883_v44, %v601_v45 }
 0x192   : > { %v887_v47 = vpop.eup %886  ;;  %v616_v61 = vmul.f32 %v885_v46, %v601_v45 }
 0x193   : > { %v889_v49 = vpop.eup %888  ;;  %v617_v51 = vmul.f32 %v887_v47, %v606_v48 }
 0x194   : > { %v891_v52 = vpop.eup %890  ;;  %v618_v54 = vmul.f32 %v889_v49, %v606_v48 }
 0x195   : > { %v893_v55 = vpop.eup %892  ;;  %v625_v57 = vadd.f32 %v617_v51, %v613_v50  ;;  %v619_v58 = vmul.f32 %v891_v52, %v606_v48  ;;  %v686_v51 = vsub.s32 %v683_v41, %v1101_v17 }
 0x196   : > { %v895_v59 = vpop.eup %894  ;;  %v634_v62 = vadd.f32 %v618_v54, %v614_v53  ;;  %v620_v63 = vmul.f32 %v893_v55, %v606_v48 }
 0x197   : > { %v897_v0 = vpop.eup %896  ;;  %v643_v1 = vadd.f32 %v619_v58, %v615_v56  ;;  %v621_v2 = vmul.f32 %v895_v59, %v611_v60 }
 0x198   : > { %v899_v3 = vpop.eup %898  ;;  %v652_v4 = vadd.f32 %v620_v63, %v616_v61  ;;  %v622_v5 = vmul.f32 %v897_v0, %v611_v60 }
 0x199   : > { %v901_v6 = vpop.eup %900  ;;  %v626_v7 = vsel %vm404_vm0, %v621_v2, 0.0  ;;  %v623_v8 = vmul.f32 %v899_v3, %v611_v60 }
 0x19a   : > { %v627_v9 = vadd.f32 %v626_v7, %v625_v57  ;;  %v635_v10 = vsel %vm404_vm0, %v622_v5, 0.0  ;;  %v624_v11 = vmul.f32 %v901_v6, %v611_v60 }
 0x19b   : > { %v644_v12 = vsel %vm404_vm0, %v623_v8, 0.0  ;;  %v636_v13 = vadd.f32 %v635_v10, %v634_v62 }
 0x19c   : > { %v628_v14 = vrot.slane %v627_v9, 4  ;;  %v645_v19 = vadd.f32 %v644_v12, %v643_v1  ;;  %v653_v20 = vsel %vm404_vm0, %v624_v11, 0.0 }
 0x19d   : > { %v637_v21 = vrot.slane %v636_v13, 4  ;;  %v654_v22 = vadd.f32 %v653_v20, %v652_v4 }
 0x19e   : > { %v629_v23 = vadd.f32 %v628_v14, %v627_v9  ;;  %v646_v24 = vrot.slane %v645_v19, 4 }
 0x19f   : > { %v638_v25 = vadd.f32 %v637_v21, %v636_v13  ;;  %v655_v26 = vrot.slane %v654_v22, 4 }
 0x1a0   : > { %v630_v27 = vrot.slane %v629_v23, 2  ;;  %v647_v15 = vadd.f32 %v646_v24, %v645_v19 }
 0x1a1   : > { %v639_v28 = vrot.slane %v638_v25, 2  ;;  %v656_v29 = vadd.f32 %v655_v26, %v654_v22 }
 0x1a2   : > { %v631_v32 = vadd.f32 %v630_v27, %v629_v23  ;;  %v648_v33 = vrot.slane %v647_v15, 2 }
 0x1a3   : > { %v640_v35 = vadd.f32 %v639_v28, %v638_v25  ;;  %v657_v36 = vrot.slane %v656_v29, 2 }
 0x1a4   : > { %v649_v37 = vadd.f32 %v648_v33, %v647_v15  ;;  %v632_v38 = vrot.slane %v631_v32, 1 }
 0x1a5   : > { %v658_v39 = vadd.f32 %v657_v36, %v656_v29  ;;  %v641_v40 = vrot.slane %v640_v35, 1 }
 0x1a6   : > { %v633_v43 = vadd.f32 %v632_v38, %v631_v32  ;;  %v650_v44 = vrot.slane %v649_v37, 1 }
 0x1a7   : > { %v642_v45 = vadd.f32 %v641_v40, %v640_v35  ;;  %v659_v46 = vrot.slane %v658_v39, 1 }
 0x1a8   : > { %v651_v47 = vadd.f32 %v650_v44, %v649_v37  ;;  %v671_v48 = vadd.f32 %v670_v42, %v633_v43 }
 0x1a9   : > { %v660_v49 = vadd.f32 %v659_v46, %v658_v39  ;;  %v672_v50 = vadd.f32 %v670_v42, %v642_v45 }
 0x1aa   : > { %v673_v52 = vadd.f32 %v670_v42, %v651_v47 }
 0x1ab   : > { %v674_v53 = vadd.f32 %v670_v42, %v660_v49  ;;  %v679_v54 = vcombine.low %v671_v48, %v672_v50 }
 0x1ad   : > { %v680_v55 = vcombine.low %v673_v52, %v674_v53  ;;  %v687_v56 = vrot.slane %v679_v54, %v686_v51 }
 0x1af   : > { %v694_v18 = vrot.slane %v680_v55, %v686_v51 }
 0x1b1   : > { %v695_v57 = vcombine.low %v687_v56, %v694_v18 }
 0x1b3   : > { %v702_v58 = vrot.slane %v695_v57, %v686_v51 }
 0x1b5   : > { %708 = vst.msk [vmem:[%s272_s21] sm:$0xf] %vm706_vm2, %v702_v58 }
 0x1b6   : > { %915 = shalt.err (!%p912_p3)
}
 0x1b7   : > { %s916_s15 = scalar_lea.hbm %s1148_s25, 64  ;;  %s920_s18 = scalar_lea.hbm %s1197_s7, 128 }
 0x1b8   : > { %p917_p4 = scmp.ne.s32.totalorder %s1148_s25, %s916_s15  ;;  %p921_p9 = scmp.lt.u32.totalorder %s1148_s25, %s1197_s7 }
 0x1b9   : > { %p922_p10 = scmp.lt.u32.totalorder %s920_s18, %s916_s15  ;;  %p924_p12 = scmp.lt.u32.totalorder %s916_s15, %s1148_s25 }
 0x1ba   : > { %p918_p7 = pnand %p917_p4, %p1051_p5 }
 0x1bb   : > { %p923_p11 = por %p922_p10, %p921_p9 }
 0x1bc   : > { %p919_p8 = pneg %p918_p7 }
 0x1bd   : > { %p925_p13 = por %p924_p12, %p923_p11 }
 0x1bf   : > { %p926_p0 = pnand %p925_p13, %p919_p8 }
 0x1c1   : > { %929 = shalt.err (!%p926_p0)
}
 0x1c2   : > { %810 = dma.vmem_to_hbm [thread:$0]  (%p1051_p5), %s1150_s22, 64, %s1148_s25, %s710_s30  }
 0x1c3 PF: > { %p816_p1 = scmp.ge.s32.totalorder %s964_s29, 2  ;;  %s736_s21 = sand.u32 1, %s952_s26  }
 0x1c4   : > { %s737_s23 = scalar_lea.sflag [#allocation4], %s736_s21 }
 0x1c5   : > { %p813_p2 = pnand %p816_p1, %p1055_p6 }
 0x1c7   : > { %947 = dma.done.wait (!%p813_p2), %s737_s23, 64  }
 0x1c8   : > { %949 = vsyncadd (!%p813_p2), %s737_s23, 4294967232  ;;  %p19_p3 = scmp.ge.s32.totalorder %s1038_s8, 4   ;;  %s1200_s26 = smov %s956_s27 }
 0x1c9   : > { %s1201_s27 = smov %s960_s28  ;;  %s1202_s28 = smov %s1049_s11 }
 0x1ca   : > { %s1203_s29 = smov %s1038_s8  ;;  %21 = sbr.rel (!%p19_p3) target bundleno = 6 (0x6), region = 83 }
 0x1d1   :  { %742 = vsyncpa [#allocation4], 1 }
 0x1d2   :  { %744 = vsyncpa [#allocation4 + $0x1], 1 }

</bundles_post_ra>
